<compile_context>
chip_gen: v5e
topology: v5e:2x2
jax: 0.10.0
libtpu: 0.0.40
codegen_flags: <defaults>
</compile_context>

<pallas_src>
import jax
import jax.numpy as jnp
from jax.experimental import pallas as pl
from jax.experimental.pallas import tpu as pltpu

_LANE = 1024                 # fallback slab width (multiple of 128)
_MAX_TILE_COLS = 2048        # cap on the lane-dim block width
_TARGET_TILE_BYTES = 4 << 20 # ~4 MiB per block -> near HBM roofline on all dtypes


def _soft_clamp5_kernel(x_ref, o_ref):
    # Compute in f32 (tanh on the EUP), cast once at the store.
    # TODO(synk): integer inputs are cast back to int here; PyTorch's in-place tanh_
    # on integer tensors is an error, so there is no exact integer-dtype equivalent.
    x = x_ref[...].astype(jnp.float32)
    o_ref[...] = (5.0 * jnp.tanh(x * 0.2)).astype(o_ref.dtype)


def _round_up(n: int, m: int) -> int:
    return ((n + m - 1) // m) * m


def _run_2d(x2: jax.Array) -> jax.Array:
    """Run the elementwise kernel over a 2D (rows, cols) slab with cols % 128 == 0."""
    R, W = x2.shape
    itemsize = jnp.dtype(x2.dtype).itemsize
    sub = max(8, 32 // itemsize)  # sublane multiple: 8 f32 / 16 bf16 / 32 int8

    # Byte-based tile sizing.
    tile_cols = W if W <= _MAX_TILE_COLS else _MAX_TILE_COLS
    target_rows = max(sub, (_TARGET_TILE_BYTES // (tile_cols * itemsize)) // sub * sub)
    tile_rows = R if R <= target_rows else target_rows

    # v7x has 2 TensorCores: make sure a >1 MiB tensor gives >= 2 grid steps.
    if (R * W * itemsize > (1 << 20)
            and pl.cdiv(R, tile_rows) * pl.cdiv(W, tile_cols) < 2):
        if R >= 2 * sub:
            tile_rows = _round_up(pl.cdiv(R, 2), sub)
        elif W >= 2 * 128:
            tile_cols = _round_up(pl.cdiv(W, 2), 128)

    grid = (pl.cdiv(R, tile_rows), pl.cdiv(W, tile_cols))
    block = (tile_rows, tile_cols)
    index_map = lambda i, j: (i, j)

    return pl.pallas_call(
        _soft_clamp5_kernel,
        out_shape=jax.ShapeDtypeStruct((R, W), x2.dtype),
        grid_spec=pltpu.PrefetchScalarGridSpec(
            num_scalar_prefetch=0,
            grid=grid,
            in_specs=[pl.BlockSpec(block, index_map)],
            out_specs=pl.BlockSpec(block, index_map),
        ),
        compiler_params=pltpu.CompilerParams(
            dimension_semantics=("parallel", "parallel"),
            vmem_limit_bytes=32 << 20,
        ),
    )(x2)


def soft_clamp5(x: jax.Array) -> jax.Array:
    """Applies y = 5 * tanh(x / 5) elementwise. Accepts any shape/dtype."""
    orig_shape = x.shape
    n = int(x.size)
    if n == 0:
        return x

    # Case A: collapse trailing dims into a lane-dense width W (multiple of 128)
    # -> pure dim-collapse reshape (free), no padding, no trailing slice.
    W = 1
    for d in range(x.ndim - 1, -1, -1):
        W *= int(orig_shape[d])
        if W % 128 == 0:
            break
    if W % 128 == 0:
        R = n // W
        out2 = _run_2d(x.reshape(R, W))
        return out2.reshape(orig_shape)

    # Case B (n not a multiple of 128): flatten and pad only up to a multiple of
    # _LANE (<= 1023 elements), then slice back.
    rows = pl.cdiv(n, _LANE)
    n_pad = rows * _LANE
    x_flat = x.reshape(-1)
    if n_pad != n:
        x_flat = jnp.pad(x_flat, (0, n_pad - n))
    out2 = _run_2d(x_flat.reshape(rows, _LANE))
    out_flat = out2.reshape(-1)
    if n_pad != n:
        out_flat = out_flat[:n]
    return out_flat.reshape(orig_shape)


if __name__ == "__main__":
    key = jax.random.PRNGKey(0)
    # Small NCHW input consistent with a conv-net activation tensor.
    x = jax.random.normal(key, (2, 4, 16, 16), dtype=jnp.float32) * 10.0

    y = jax.block_until_ready(soft_clamp5(x))

    # Reference check in plain JAX.
    y_ref = 5.0 * jnp.tanh(x / 5.0)
    assert y.shape == x.shape and y.dtype == x.dtype
    assert jnp.max(jnp.abs(y - y_ref)) < 1e-5

    print("KERNEL_OK")
</pallas_src>

<mosaic_0001>
module attributes {stable_mosaic.version = 11 : i64} {
  func.func @_soft_clamp5_kernel(%arg0: i32, %arg1: i32, %arg2: memref<8x256xf32, #tpu.memory_space<vmem>>, %arg3: memref<8x256xf32, #tpu.memory_space<vmem>>) attributes {dimension_semantics = [#tpu.dimension_semantics<parallel>, #tpu.dimension_semantics<parallel>], iteration_bounds = array<i64: 1, 1>, scalar_prefetch = 0 : i64, scratch_operands = 0 : i64, tpu.core_type = #tpu.core_type<tc>, window_params = [{transform_indices = @transform_0, window_bounds = array<i64: 8, 256>}, {transform_indices = @transform_1, window_bounds = array<i64: 8, 256>}]} {
    %c0 = arith.constant 0 : index
    %c0_0 = arith.constant 0 : index
    %0 = vector.load %arg2[%c0, %c0_0] : memref<8x256xf32, #tpu.memory_space<vmem>>, vector<8x256xf32>
    %cst = arith.constant 2.000000e-01 : f32
    %1 = vector.broadcast %cst : f32 to vector<8x256xf32>
    %2 = arith.mulf %0, %1 : vector<8x256xf32>
    %3 = math.tanh %2 : vector<8x256xf32>
    %cst_1 = arith.constant 5.000000e+00 : f32
    %4 = vector.broadcast %cst_1 : f32 to vector<8x256xf32>
    %5 = arith.mulf %4, %3 : vector<8x256xf32>
    %c0_2 = arith.constant 0 : index
    %c0_3 = arith.constant 0 : index
    %6 = vector.load %arg3[%c0_2, %c0_3] : memref<8x256xf32, #tpu.memory_space<vmem>>, vector<8x256xf32>
    tpu.vector_store %arg3[%c0_2, %c0_3], %5 {strides = array<i32>} : memref<8x256xf32, #tpu.memory_space<vmem>>, vector<8x256xf32>,
    return
  }
  func.func @transform_0(%arg0: i32, %arg1: i32) -> (i32, i32) {
    %c0_i32 = arith.constant 0 : i32
    return %arg0, %arg1 : i32, i32
  }
  func.func @transform_1(%arg0: i32, %arg1: i32) -> (i32, i32) {
    %c0_i32 = arith.constant 0 : i32
    return %arg0, %arg1 : i32, i32
  }
}

</mosaic_0001>

<bundles_post_ra>
// kernel: tpu_custom_call.1
= control target key start
LH: loop header
LB: loop body
LE: loop exit
PB: predicated region body
PF: predicated region fallthrough
CT: control target
= control target key end

     0   :  { %6 = vsyncpa [#allocation3], 0  ;;  %s126_s0 = inlined_call_operand.hbm [shape: f32[8,256], index: 0, kind: input, shape index: {}]   ;;  %s127_s1 = inlined_call_operand.hbm [shape: f32[8,256], index: 1, kind: output, shape index: {}]  }
   0x1   :  { %7 = vsyncpa [#allocation4], 0  ;;  %s13_s8 = sshll.u32 %s126_s0, 4  ;;  %s108_s9 = smov [#allocation2]   ;;  %s14_s8 = int_to_ptr.hbm [resolvable:$true] %s13_s8 }
   0x2   :  { %s15_s10 = sshll.u32 %s108_s9, 4  ;;  %s16_s10 = int_to_ptr.vmem [resolvable:$true] %s15_s10 }
   0x3   :  { %18 = dma.hbm_to_vmem [thread:$0]  %s14_s8, 256, %s16_s10, [#allocation3]  }
   0x4   :  { %104 = dma.done.wait [#allocation3], 256  }
   0x5   :  { %105 = vsyncadd [#allocation3], 4294967040  ;;  %v23_v0 = vld [vmem:[#allocation2] sm:$0xff]  ;;  %v24_v1 = vld [vmem:[#allocation2 + $0x8] sm:$0xff]  ;;  %s109_s11 = smov [#allocation5]   ;;  %s40_s15 = sshll.u32 %s127_s1, 4  ;;  %s41_s15 = int_to_ptr.hbm [resolvable:$true] %s40_s15 }
   0x6   :  { %v25_v2 = vmul.f32 0.2, %v23_v0  ;;  %v26_v3 = vmul.f32 0.2, %v24_v1  ;;  %s38_s12 = sshll.u32 %s109_s11, 4  ;;  %s39_s12 = int_to_ptr.vmem [resolvable:$true] %s38_s12 }
   0x8   :  { %52 = vtanh.f32 %v25_v2 }
   0x9   :  { %54 = vtanh.f32 %v26_v3 }
   0xe   :  { %v53_v4 = vpop.eup %52 }
   0xf   :  { %v55_v5 = vpop.eup %54  ;;  %v29_v6 = vmul.f32 5.0, %v53_v4 }
  0x10   :  { %v30_v7 = vmul.f32 5.0, %v55_v5 }
  0x11   :  { %31 = vst [vmem:[#allocation5] sm:$0xff] %v29_v6 }
  0x12   :  { %32 = vst [vmem:[#allocation5 + $0x8] sm:$0xff] %v30_v7 }
  0x13   :  { %43 = dma.vmem_to_hbm [thread:$0]  %s39_s12, 256, %s41_s15, [#allocation4]  }
  0x14   :  { %106 = dma.done.wait [#allocation4], 256  }
  0x15   :  { %107 = vsyncadd [#allocation4], 4294967040 }
  0x16   :  { %48 = vsyncpa [#allocation3], 1 }
  0x17   :  { %49 = vsyncpa [#allocation4], 1 }

</bundles_post_ra>
